<compile_context>
chip_gen: v7x
topology: tpu7x:2x2x1
jax: 0.10.0
libtpu: 0.0.40
codegen_flags: <defaults>
</compile_context>

<pallas_src>
import jax
import jax.numpy as jnp
import numpy as np
from jax.experimental import pallas as pl
from jax.experimental.pallas import tpu as pltpu  # noqa: F401  (kept for TPU-specific tuning hooks)

# ---------------- model dims (small, consistent with the module) ----------------
B = 2            # batch
N = 8            # sequence length
D = 32           # d_model
H = 4            # num_heads
DEPTH = D // H   # per-head depth
FFN = D * 2      # ffn_expansion = 2
EPS = 1e-5       # nn.LayerNorm default eps
BN = B * N       # flattened batch*sequence (matmul M dimension)


def _layer_norm(x, gamma, beta):
    # x: (BN, D); gamma/beta: (1, D)
    mu = jnp.mean(x, axis=-1, keepdims=True)
    var = jnp.mean((x - mu) ** 2, axis=-1, keepdims=True)
    return (x - mu) * jax.lax.rsqrt(var + EPS) * gamma + beta


def _softmax_last(x):
    m = jnp.max(x, axis=-1, keepdims=True)
    e = jnp.exp(x - m)
    s = jnp.sum(e, axis=-1, keepdims=True)
    # divide goes to the EUP slot (otherwise idle) instead of the VPU
    return e * pl.reciprocal(s, approx=True)


def encoder_layer_kernel(x_ref, wqkv_ref, wo_ref, w1_ref, w2_ref, slab_ref, o_ref):
    x = x_ref[...]          # (BN, D)
    slab = slab_ref[...]    # (8, 3D) packed small vectors

    bqkv = slab[0:1, :]         # (1, 3D)  (q-part pre-scaled by 1/sqrt(depth))
    b1   = slab[1:2, :FFN]      # (1, FFN)
    bo   = slab[2:3, :D]
    b2   = slab[3:4, :D]
    g1   = slab[4:5, :D]
    be1  = slab[5:6, :D]
    g2   = slab[6:7, :D]
    be2  = slab[7:8, :D]

    # ---- fused QKV projection: one MXU matmul instead of three ----
    qkv = jnp.dot(x, wqkv_ref[...], preferred_element_type=jnp.float32) + bqkv  # (BN, 3D)

    # ---- split heads into a single einsum batch dim (H*B, N, DEPTH) ----
    # Lane slices + tile-aligned leading-dim reshapes only (no lane-splitting reshape).
    def split_heads(base):
        heads = [
            qkv[:, base + h * DEPTH: base + (h + 1) * DEPTH].reshape(B, N, DEPTH)
            for h in range(H)
        ]
        return jnp.stack(heads, axis=0).reshape(H * B, N, DEPTH)

    qh = split_heads(0)        # (H*B, N, DEPTH), already scaled via folded wq
    kh = split_heads(D)
    vh = split_heads(2 * D)

    # ---- batched attention: 2 batched dot_generals over all heads/batches ----
    scores = jnp.einsum('bnd,bmd->bnm', qh, kh,
                        preferred_element_type=jnp.float32)          # (H*B, N, N)
    attn = _softmax_last(scores)
    ctx = jnp.einsum('bnm,bmd->bnd', attn, vh,
                     preferred_element_type=jnp.float32)             # (H*B, N, DEPTH)

    # ---- merge heads back to (BN, D): head h -> lane block h ----
    merged = jnp.concatenate(
        [ctx[h * B:(h + 1) * B].reshape(BN, DEPTH) for h in range(H)], axis=-1)

    attn_out = jnp.dot(merged, wo_ref[...],
                       preferred_element_type=jnp.float32) + bo

    # ---- residual + layernorm 1 ----
    x1 = _layer_norm(x + attn_out, g1, be1)

    # ---- FFN: Linear -> ReLU -> Linear ----
    hdn = jnp.maximum(
        jnp.dot(x1, w1_ref[...], preferred_element_type=jnp.float32) + b1, 0.0)
    ffn_out = jnp.dot(hdn, w2_ref[...], preferred_element_type=jnp.float32) + b2

    # ---- residual + layernorm 2 ----
    x2 = _layer_norm(x1 + ffn_out, g2, be2)

    o_ref[...] = x2.astype(o_ref.dtype)


def pack_params(params):
    """Fold the attention scale into wq/bq, fuse QKV, and pack small vectors into one slab."""
    (wq, bq, wk, bk, wv, bv, wo, bo, g1, be1, w1, b1, w2, b2, g2, be2) = params
    scale = 1.0 / (DEPTH ** 0.5)
    wqkv = jnp.concatenate([wq * scale, wk, wv], axis=1)   # (D, 3D)
    bqkv = jnp.concatenate([bq * scale, bk, bv], axis=1)   # (1, 3D)

    slab = jnp.zeros((8, 3 * D), jnp.float32)
    slab = slab.at[0, :].set(bqkv[0])
    slab = slab.at[1, :FFN].set(b1[0])
    slab = slab.at[2, :D].set(bo[0])
    slab = slab.at[3, :D].set(b2[0])
    slab = slab.at[4, :D].set(g1[0])
    slab = slab.at[5, :D].set(be1[0])
    slab = slab.at[6, :D].set(g2[0])
    slab = slab.at[7, :D].set(be2[0])
    return wqkv, wo, w1, w2, slab


def transformer_encoder_layer(x, packed):
    wqkv, wo, w1, w2, slab = packed
    x_flat = x.reshape(BN, D)   # flatten batch into the matmul M dimension (wrapper-side, free)
    out_flat = pl.pallas_call(
        encoder_layer_kernel,
        out_shape=jax.ShapeDtypeStruct((BN, D), x.dtype),
        # No grid: one invocation, all operands resident as whole-array VMEM blocks
        # (total footprint ~30 KB, far below VMEM on v5e/v6e/v7x).
    )(x_flat, wqkv, wo, w1, w2, slab)
    return out_flat.reshape(B, N, D)


# ------------------------- pure-JAX reference for checking -------------------------
def reference_forward(x, params):
    (wq, bq, wk, bk, wv, bv, wo, bo, g1, be1, w1, b1, w2, b2, g2, be2) = params

    def ln(y, g, be):
        mu = jnp.mean(y, axis=-1, keepdims=True)
        var = jnp.mean((y - mu) ** 2, axis=-1, keepdims=True)
        return (y - mu) / jnp.sqrt(var + EPS) * g + be

    q = x @ wq + bq
    k = x @ wk + bk
    v = x @ wv + bv

    def split(t):  # (B,N,D) -> (B,H,N,depth)
        return t.reshape(B, N, H, DEPTH).transpose(0, 2, 1, 3)

    qh, kh, vh = split(q), split(k), split(v)
    scores = jnp.einsum('bhnd,bhmd->bhnm', qh, kh) / (DEPTH ** 0.5)
    attn = jax.nn.softmax(scores, axis=-1)
    out = jnp.einsum('bhnm,bhmd->bhnd', attn, vh)
    out = out.transpose(0, 2, 1, 3).reshape(B, N, D)
    attn_out = out @ wo + bo

    x1 = ln(x + attn_out, g1, be1)
    ffn_out = jnp.maximum(x1 @ w1 + b1, 0.0) @ w2 + b2
    return ln(x1 + ffn_out, g2, be2)


def init_params(key):
    ks = jax.random.split(key, 8)
    scale = 0.1
    wq = scale * jax.random.normal(ks[0], (D, D), jnp.float32)
    wk = scale * jax.random.normal(ks[1], (D, D), jnp.float32)
    wv = scale * jax.random.normal(ks[2], (D, D), jnp.float32)
    wo = scale * jax.random.normal(ks[3], (D, D), jnp.float32)
    w1 = scale * jax.random.normal(ks[4], (D, FFN), jnp.float32)
    w2 = scale * jax.random.normal(ks[5], (FFN, D), jnp.float32)
    bq = 0.01 * jnp.ones((1, D), jnp.float32)
    bk = -0.01 * jnp.ones((1, D), jnp.float32)
    bv = 0.02 * jnp.ones((1, D), jnp.float32)
    bo = jnp.zeros((1, D), jnp.float32)
    b1 = 0.01 * jnp.ones((1, FFN), jnp.float32)
    b2 = jnp.zeros((1, D), jnp.float32)
    g1 = jnp.ones((1, D), jnp.float32)
    be1 = jnp.zeros((1, D), jnp.float32)
    g2 = jnp.ones((1, D), jnp.float32)
    be2 = jnp.zeros((1, D), jnp.float32)
    return (wq, bq, wk, bk, wv, bv, wo, bo, g1, be1, w1, b1, w2, b2, g2, be2)


if __name__ == "__main__":
    key = jax.random.PRNGKey(0)
    k_x, k_p = jax.random.split(key)
    x = jax.random.normal(k_x, (B, N, D), jnp.float32)
    params = init_params(k_p)
    packed = pack_params(params)

    out = jax.block_until_ready(transformer_encoder_layer(x, packed))
    ref = jax.block_until_ready(reference_forward(x, params))
    np.testing.assert_allclose(np.asarray(out), np.asarray(ref), rtol=2e-2, atol=2e-2)

    print("KERNEL_OK")
</pallas_src>

<mosaic_0001>
module attributes {stable_mosaic.version = 11 : i64} {
  func.func @encoder_layer_kernel(%arg0: memref<16x32xf32, #tpu.memory_space<vmem>>, %arg1: memref<32x96xf32, #tpu.memory_space<vmem>>, %arg2: memref<32x32xf32, #tpu.memory_space<vmem>>, %arg3: memref<32x64xf32, #tpu.memory_space<vmem>>, %arg4: memref<64x32xf32, #tpu.memory_space<vmem>>, %arg5: memref<8x96xf32, #tpu.memory_space<vmem>>, %arg6: memref<16x32xf32, #tpu.memory_space<vmem>>) attributes {dimension_semantics = [], scalar_prefetch = 0 : i64, scratch_operands = 0 : i64, tpu.core_type = #tpu.core_type<tc>} {
    %c0 = arith.constant 0 : index
    %c0_0 = arith.constant 0 : index
    %0 = vector.load %arg0[%c0, %c0_0] : memref<16x32xf32, #tpu.memory_space<vmem>>, vector<16x32xf32>
    %c0_1 = arith.constant 0 : index
    %c0_2 = arith.constant 0 : index
    %1 = vector.load %arg5[%c0_1, %c0_2] : memref<8x96xf32, #tpu.memory_space<vmem>>, vector<8x96xf32>
    %2 = vector.extract_strided_slice %1 {offsets = [0, 0], sizes = [1, 96], strides = [1, 1]} : vector<8x96xf32> to vector<1x96xf32>
    %3 = vector.extract_strided_slice %1 {offsets = [1, 0], sizes = [1, 64], strides = [1, 1]} : vector<8x96xf32> to vector<1x64xf32>
    %4 = vector.extract_strided_slice %1 {offsets = [2, 0], sizes = [1, 32], strides = [1, 1]} : vector<8x96xf32> to vector<1x32xf32>
    %5 = vector.extract_strided_slice %1 {offsets = [3, 0], sizes = [1, 32], strides = [1, 1]} : vector<8x96xf32> to vector<1x32xf32>
    %6 = vector.extract_strided_slice %1 {offsets = [4, 0], sizes = [1, 32], strides = [1, 1]} : vector<8x96xf32> to vector<1x32xf32>
    %7 = vector.extract_strided_slice %1 {offsets = [5, 0], sizes = [1, 32], strides = [1, 1]} : vector<8x96xf32> to vector<1x32xf32>
    %8 = vector.extract_strided_slice %1 {offsets = [6, 0], sizes = [1, 32], strides = [1, 1]} : vector<8x96xf32> to vector<1x32xf32>
    %9 = vector.extract_strided_slice %1 {offsets = [7, 0], sizes = [1, 32], strides = [1, 1]} : vector<8x96xf32> to vector<1x32xf32>
    %c0_3 = arith.constant 0 : index
    %c0_4 = arith.constant 0 : index
    %10 = vector.load %arg1[%c0_3, %c0_4] : memref<32x96xf32, #tpu.memory_space<vmem>>, vector<32x96xf32>
    %cst = arith.constant dense<0.000000e+00> : vector<16x96xf32>
    %11 = tpu.matmul %0, %10, %cst {dimension_numbers = #tpu.dot_dimension_numbers<[1], [0], [0], [1], [0, 0, 1, 1], [], []>} : vector<16x32xf32>, vector<32x96xf32>, vector<16x96xf32> -> vector<16x96xf32>
    %12 = vector.broadcast %2 : vector<1x96xf32> to vector<16x96xf32>
    %13 = arith.addf %11, %12 : vector<16x96xf32>
    %14 = vector.extract_strided_slice %13 {offsets = [0, 0], sizes = [16, 8], strides = [1, 1]} : vector<16x96xf32> to vector<16x8xf32>
    %15 = vector.shape_cast %14 : vector<16x8xf32> to vector<2x8x8xf32>
    %16 = vector.extract_strided_slice %13 {offsets = [0, 8], sizes = [16, 8], strides = [1, 1]} : vector<16x96xf32> to vector<16x8xf32>
    %17 = vector.shape_cast %16 : vector<16x8xf32> to vector<2x8x8xf32>
    %18 = vector.extract_strided_slice %13 {offsets = [0, 16], sizes = [16, 8], strides = [1, 1]} : vector<16x96xf32> to vector<16x8xf32>
    %19 = vector.shape_cast %18 : vector<16x8xf32> to vector<2x8x8xf32>
    %20 = vector.extract_strided_slice %13 {offsets = [0, 24], sizes = [16, 8], strides = [1, 1]} : vector<16x96xf32> to vector<16x8xf32>
    %21 = vector.shape_cast %20 : vector<16x8xf32> to vector<2x8x8xf32>
    %22 = vector.shape_cast %15 : vector<2x8x8xf32> to vector<1x2x8x8xf32>
    %23 = vector.shape_cast %17 : vector<2x8x8xf32> to vector<1x2x8x8xf32>
    %24 = vector.shape_cast %19 : vector<2x8x8xf32> to vector<1x2x8x8xf32>
    %25 = vector.shape_cast %21 : vector<2x8x8xf32> to vector<1x2x8x8xf32>
    %26 = tpu.concatenate %22, %23, %24, %25 in 0 : vector<1x2x8x8xf32>, vector<1x2x8x8xf32>, vector<1x2x8x8xf32>, vector<1x2x8x8xf32> -> vector<4x2x8x8xf32>
    %27 = vector.shape_cast %26 : vector<4x2x8x8xf32> to vector<8x8x8xf32>
    %28 = vector.extract_strided_slice %13 {offsets = [0, 32], sizes = [16, 8], strides = [1, 1]} : vector<16x96xf32> to vector<16x8xf32>
    %29 = vector.shape_cast %28 : vector<16x8xf32> to vector<2x8x8xf32>
    %30 = vector.extract_strided_slice %13 {offsets = [0, 40], sizes = [16, 8], strides = [1, 1]} : vector<16x96xf32> to vector<16x8xf32>
    %31 = vector.shape_cast %30 : vector<16x8xf32> to vector<2x8x8xf32>
    %32 = vector.extract_strided_slice %13 {offsets = [0, 48], sizes = [16, 8], strides = [1, 1]} : vector<16x96xf32> to vector<16x8xf32>
    %33 = vector.shape_cast %32 : vector<16x8xf32> to vector<2x8x8xf32>
    %34 = vector.extract_strided_slice %13 {offsets = [0, 56], sizes = [16, 8], strides = [1, 1]} : vector<16x96xf32> to vector<16x8xf32>
    %35 = vector.shape_cast %34 : vector<16x8xf32> to vector<2x8x8xf32>
    %36 = vector.shape_cast %29 : vector<2x8x8xf32> to vector<1x2x8x8xf32>
    %37 = vector.shape_cast %31 : vector<2x8x8xf32> to vector<1x2x8x8xf32>
    %38 = vector.shape_cast %33 : vector<2x8x8xf32> to vector<1x2x8x8xf32>
    %39 = vector.shape_cast %35 : vector<2x8x8xf32> to vector<1x2x8x8xf32>
    %40 = tpu.concatenate %36, %37, %38, %39 in 0 : vector<1x2x8x8xf32>, vector<1x2x8x8xf32>, vector<1x2x8x8xf32>, vector<1x2x8x8xf32> -> vector<4x2x8x8xf32>
    %41 = vector.shape_cast %40 : vector<4x2x8x8xf32> to vector<8x8x8xf32>
    %42 = vector.extract_strided_slice %13 {offsets = [0, 64], sizes = [16, 8], strides = [1, 1]} : vector<16x96xf32> to vector<16x8xf32>
    %43 = vector.shape_cast %42 : vector<16x8xf32> to vector<2x8x8xf32>
    %44 = vector.extract_strided_slice %13 {offsets = [0, 72], sizes = [16, 8], strides = [1, 1]} : vector<16x96xf32> to vector<16x8xf32>
    %45 = vector.shape_cast %44 : vector<16x8xf32> to vector<2x8x8xf32>
    %46 = vector.extract_strided_slice %13 {offsets = [0, 80], sizes = [16, 8], strides = [1, 1]} : vector<16x96xf32> to vector<16x8xf32>
    %47 = vector.shape_cast %46 : vector<16x8xf32> to vector<2x8x8xf32>
    %48 = vector.extract_strided_slice %13 {offsets = [0, 88], sizes = [16, 8], strides = [1, 1]} : vector<16x96xf32> to vector<16x8xf32>
    %49 = vector.shape_cast %48 : vector<16x8xf32> to vector<2x8x8xf32>
    %50 = vector.shape_cast %43 : vector<2x8x8xf32> to vector<1x2x8x8xf32>
    %51 = vector.shape_cast %45 : vector<2x8x8xf32> to vector<1x2x8x8xf32>
    %52 = vector.shape_cast %47 : vector<2x8x8xf32> to vector<1x2x8x8xf32>
    %53 = vector.shape_cast %49 : vector<2x8x8xf32> to vector<1x2x8x8xf32>
    %54 = tpu.concatenate %50, %51, %52, %53 in 0 : vector<1x2x8x8xf32>, vector<1x2x8x8xf32>, vector<1x2x8x8xf32>, vector<1x2x8x8xf32> -> vector<4x2x8x8xf32>
    %55 = vector.shape_cast %54 : vector<4x2x8x8xf32> to vector<8x8x8xf32>
    "tpu.trace_start"() <{level = 10 : i32, message = "bnd,bmd->bnm"}> : () -> ()
    %cst_5 = arith.constant dense<0.000000e+00> : vector<8x8x8xf32>
    %56 = tpu.matmul %27, %41, %cst_5 {dimension_numbers = #tpu.dot_dimension_numbers<[2], [2], [1], [1], [0, 0, 0, 1, 1, 1], [0], [0]>} : vector<8x8x8xf32>, vector<8x8x8xf32>, vector<8x8x8xf32> -> vector<8x8x8xf32>
    "tpu.trace_stop"() : () -> ()
    %cst_6 = arith.constant dense<0xFF800000> : vector<8x8xf32>
    %57 = vector.multi_reduction <maximumf>, %56, %cst_6 [2] : vector<8x8x8xf32> to vector<8x8xf32>
    %58 = vector.shape_cast %57 : vector<8x8xf32> to vector<8x8x1xf32>
    %59 = vector.broadcast %58 : vector<8x8x1xf32> to vector<8x8x8xf32>
    %60 = arith.subf %56, %59 : vector<8x8x8xf32>
    %61 = math.exp %60 : vector<8x8x8xf32>
    %cst_7 = arith.constant dense<0.000000e+00> : vector<8x8xf32>
    %62 = vector.multi_reduction <add>, %61, %cst_7 [2] : vector<8x8x8xf32> to vector<8x8xf32>
    %63 = vector.shape_cast %62 : vector<8x8xf32> to vector<8x8x1xf32>
    %64 = tpu.reciprocal %63 {approx = true} : vector<8x8x1xf32> -> vector<8x8x1xf32>
    %65 = vector.broadcast %64 : vector<8x8x1xf32> to vector<8x8x8xf32>
    %66 = arith.mulf %61, %65 : vector<8x8x8xf32>
    "tpu.trace_start"() <{level = 10 : i32, message = "bnm,bmd->bnd"}> : () -> ()
    %cst_8 = arith.constant dense<0.000000e+00> : vector<8x8x8xf32>
    %67 = tpu.matmul %66, %55, %cst_8 {dimension_numbers = #tpu.dot_dimension_numbers<[2], [1], [1], [2], [0, 0, 0, 1, 1, 2], [0], [0]>} : vector<8x8x8xf32>, vector<8x8x8xf32>, vector<8x8x8xf32> -> vector<8x8x8xf32>
    "tpu.trace_stop"() : () -> ()
    %68 = vector.extract_strided_slice %67 {offsets = [0, 0, 0], sizes = [2, 8, 8], strides = [1, 1, 1]} : vector<8x8x8xf32> to vector<2x8x8xf32>
    %69 = vector.shape_cast %68 : vector<2x8x8xf32> to vector<16x8xf32>
    %70 = vector.extract_strided_slice %67 {offsets = [2, 0, 0], sizes = [2, 8, 8], strides = [1, 1, 1]} : vector<8x8x8xf32> to vector<2x8x8xf32>
    %71 = vector.shape_cast %70 : vector<2x8x8xf32> to vector<16x8xf32>
    %72 = vector.extract_strided_slice %67 {offsets = [4, 0, 0], sizes = [2, 8, 8], strides = [1, 1, 1]} : vector<8x8x8xf32> to vector<2x8x8xf32>
    %73 = vector.shape_cast %72 : vector<2x8x8xf32> to vector<16x8xf32>
    %74 = vector.extract_strided_slice %67 {offsets = [6, 0, 0], sizes = [2, 8, 8], strides = [1, 1, 1]} : vector<8x8x8xf32> to vector<2x8x8xf32>
    %75 = vector.shape_cast %74 : vector<2x8x8xf32> to vector<16x8xf32>
    %76 = tpu.concatenate %69, %71, %73, %75 in 1 : vector<16x8xf32>, vector<16x8xf32>, vector<16x8xf32>, vector<16x8xf32> -> vector<16x32xf32>
    %c0_9 = arith.constant 0 : index
    %c0_10 = arith.constant 0 : index
    %77 = vector.load %arg2[%c0_9, %c0_10] : memref<32x32xf32, #tpu.memory_space<vmem>>, vector<32x32xf32>
    %cst_11 = arith.constant dense<0.000000e+00> : vector<16x32xf32>
    %78 = tpu.matmul %76, %77, %cst_11 {dimension_numbers = #tpu.dot_dimension_numbers<[1], [0], [0], [1], [0, 0, 1, 1], [], []>} : vector<16x32xf32>, vector<32x32xf32>, vector<16x32xf32> -> vector<16x32xf32>
    %79 = vector.broadcast %4 : vector<1x32xf32> to vector<16x32xf32>
    %80 = arith.addf %78, %79 : vector<16x32xf32>
    %81 = arith.addf %0, %80 : vector<16x32xf32>
    %cst_12 = arith.constant dense<0.000000e+00> : vector<16xf32>
    %82 = vector.multi_reduction <add>, %81, %cst_12 [1] : vector<16x32xf32> to vector<16xf32>
    %83 = vector.shape_cast %82 : vector<16xf32> to vector<16x1xf32>
    %cst_13 = arith.constant 3.200000e+01 : f32
    %84 = vector.broadcast %cst_13 : f32 to vector<16x1xf32>
    %85 = arith.divf %83, %84 : vector<16x1xf32>
    %86 = vector.broadcast %85 : vector<16x1xf32> to vector<16x32xf32>
    %87 = arith.subf %81, %86 : vector<16x32xf32>
    %88 = arith.mulf %87, %87 : vector<16x32xf32>
    %cst_14 = arith.constant dense<0.000000e+00> : vector<16xf32>
    %89 = vector.multi_reduction <add>, %88, %cst_14 [1] : vector<16x32xf32> to vector<16xf32>
    %90 = vector.shape_cast %89 : vector<16xf32> to vector<16x1xf32>
    %cst_15 = arith.constant 3.200000e+01 : f32
    %91 = vector.broadcast %cst_15 : f32 to vector<16x1xf32>
    %92 = arith.divf %90, %91 : vector<16x1xf32>
    %93 = vector.broadcast %85 : vector<16x1xf32> to vector<16x32xf32>
    %94 = arith.subf %81, %93 : vector<16x32xf32>
    %cst_16 = arith.constant 9.99999974E-6 : f32
    %95 = vector.broadcast %cst_16 : f32 to vector<16x1xf32>
    %96 = arith.addf %92, %95 : vector<16x1xf32>
    %97 = math.rsqrt %96 : vector<16x1xf32>
    %98 = vector.broadcast %97 : vector<16x1xf32> to vector<16x32xf32>
    %99 = arith.mulf %94, %98 : vector<16x32xf32>
    %100 = vector.broadcast %6 : vector<1x32xf32> to vector<16x32xf32>
    %101 = arith.mulf %99, %100 : vector<16x32xf32>
    %102 = vector.broadcast %7 : vector<1x32xf32> to vector<16x32xf32>
    %103 = arith.addf %101, %102 : vector<16x32xf32>
    %c0_17 = arith.constant 0 : index
    %c0_18 = arith.constant 0 : index
    %104 = vector.load %arg3[%c0_17, %c0_18] : memref<32x64xf32, #tpu.memory_space<vmem>>, vector<32x64xf32>
    %cst_19 = arith.constant dense<0.000000e+00> : vector<16x64xf32>
    %105 = tpu.matmul %103, %104, %cst_19 {dimension_numbers = #tpu.dot_dimension_numbers<[1], [0], [0], [1], [0, 0, 1, 1], [], []>} : vector<16x32xf32>, vector<32x64xf32>, vector<16x64xf32> -> vector<16x64xf32>
    %106 = vector.broadcast %3 : vector<1x64xf32> to vector<16x64xf32>
    %107 = arith.addf %105, %106 : vector<16x64xf32>
    %cst_20 = arith.constant 0.000000e+00 : f32
    %108 = vector.broadcast %cst_20 : f32 to vector<16x64xf32>
    %109 = arith.maximumf %107, %108 : vector<16x64xf32>
    %c0_21 = arith.constant 0 : index
    %c0_22 = arith.constant 0 : index
    %110 = vector.load %arg4[%c0_21, %c0_22] : memref<64x32xf32, #tpu.memory_space<vmem>>, vector<64x32xf32>
    %cst_23 = arith.constant dense<0.000000e+00> : vector<16x32xf32>
    %111 = tpu.matmul %109, %110, %cst_23 {dimension_numbers = #tpu.dot_dimension_numbers<[1], [0], [0], [1], [0, 0, 1, 1], [], []>} : vector<16x64xf32>, vector<64x32xf32>, vector<16x32xf32> -> vector<16x32xf32>
    %112 = vector.broadcast %5 : vector<1x32xf32> to vector<16x32xf32>
    %113 = arith.addf %111, %112 : vector<16x32xf32>
    %114 = arith.addf %103, %113 : vector<16x32xf32>
    %cst_24 = arith.constant dense<0.000000e+00> : vector<16xf32>
    %115 = vector.multi_reduction <add>, %114, %cst_24 [1] : vector<16x32xf32> to vector<16xf32>
    %116 = vector.shape_cast %115 : vector<16xf32> to vector<16x1xf32>
    %cst_25 = arith.constant 3.200000e+01 : f32
    %117 = vector.broadcast %cst_25 : f32 to vector<16x1xf32>
    %118 = arith.divf %116, %117 : vector<16x1xf32>
    %119 = vector.broadcast %118 : vector<16x1xf32> to vector<16x32xf32>
    %120 = arith.subf %114, %119 : vector<16x32xf32>
    %121 = arith.mulf %120, %120 : vector<16x32xf32>
    %cst_26 = arith.constant dense<0.000000e+00> : vector<16xf32>
    %122 = vector.multi_reduction <add>, %121, %cst_26 [1] : vector<16x32xf32> to vector<16xf32>
    %123 = vector.shape_cast %122 : vector<16xf32> to vector<16x1xf32>
    %cst_27 = arith.constant 3.200000e+01 : f32
    %124 = vector.broadcast %cst_27 : f32 to vector<16x1xf32>
    %125 = arith.divf %123, %124 : vector<16x1xf32>
    %126 = vector.broadcast %118 : vector<16x1xf32> to vector<16x32xf32>
    %127 = arith.subf %114, %126 : vector<16x32xf32>
    %cst_28 = arith.constant 9.99999974E-6 : f32
    %128 = vector.broadcast %cst_28 : f32 to vector<16x1xf32>
    %129 = arith.addf %125, %128 : vector<16x1xf32>
    %130 = math.rsqrt %129 : vector<16x1xf32>
    %131 = vector.broadcast %130 : vector<16x1xf32> to vector<16x32xf32>
    %132 = arith.mulf %127, %131 : vector<16x32xf32>
    %133 = vector.broadcast %8 : vector<1x32xf32> to vector<16x32xf32>
    %134 = arith.mulf %132, %133 : vector<16x32xf32>
    %135 = vector.broadcast %9 : vector<1x32xf32> to vector<16x32xf32>
    %136 = arith.addf %134, %135 : vector<16x32xf32>
    %c0_29 = arith.constant 0 : index
    %c0_30 = arith.constant 0 : index
    %137 = vector.load %arg6[%c0_29, %c0_30] : memref<16x32xf32, #tpu.memory_space<vmem>>, vector<16x32xf32>
    tpu.vector_store %arg6[%c0_29, %c0_30], %136 {strides = array<i32>} : memref<16x32xf32, #tpu.memory_space<vmem>>, vector<16x32xf32>,
    return
  }
}

</mosaic_0001>

<bundles_post_ra>
// kernel: tpu_custom_call.1
= control target key start
LH: loop header
LB: loop body
LE: loop exit
PB: predicated region body
PF: predicated region fallthrough
CT: control target
= control target key end

     0   :  { %11 = vsyncpa [#allocation3], 0  ;;  %s2564_s0 = inlined_call_operand.hbm [shape: f32[16,32], index: 0, kind: input, shape index: {}]   ;;  %s2565_s1 = inlined_call_operand.vmem [shape: f32[32,96], index: 1, kind: input, shape index: {}]   ;;  %s2566_s2 = inlined_call_operand.vmem [shape: f32[32,32], index: 2, kind: input, shape index: {}]   ;;  %s2567_s3 = inlined_call_operand.vmem [shape: f32[32,64], index: 3, kind: input, shape index: {}]   ;;  %s2568_s4 = inlined_call_operand.vmem [shape: f32[64,32], index: 4, kind: input, shape index: {}]   ;;  %s2569_s5 = inlined_call_operand.vmem [shape: f32[8,96], index: 5, kind: input, shape index: {}]   ;;  %s2570_s6 = inlined_call_operand.hbm [shape: f32[16,32], index: 6, kind: output, shape index: {}]  }
   0x1   :  { %12 = vsyncpa [#allocation4], 0  ;;  %s2221_s21 = smov [#allocation2]   ;;  %s2173_s25 = scalar_lea.hbm %s2564_s0, 256 }
   0x2   :  { %s18_s22 = sshll.u32 %s2221_s21, 4  ;;  %p2174_p0 = scmp.ne.s32.totalorder %s2564_s0, %s2173_s25  ;;  %s19_s22 = int_to_ptr.vmem [resolvable:$true] %s18_s22 }
   0x3   :  { %p2177_p1 = scmp.lt.u32.totalorder %s2173_s25, %s2564_s0 }
   0x5   :  { %p2179_p2 = pnand %p2177_p1, %p2174_p0 }
   0x7   :  { %2182 = shalt.err (!%p2179_p2)
}
   0x8   :  { %s2183_s30 = scalar_lea.vmem %s19_s22, 256  ;;  %p2188_p4 = scmp.lt.s32.totalorder %s19_s22, %s19_s22 }
   0x9   :  { %p2184_p3 = scmp.ne.s32.totalorder %s19_s22, %s2183_s30  ;;  %p2189_p5 = scmp.lt.s32.totalorder %s2183_s30, %s2183_s30 }
   0xb   :  { %p2190_p6 = por %p2189_p5, %p2188_p4 }
   0xd   :  { %p2191_p7 = pnand %p2190_p6, %p2184_p3 }
   0xf   :  { %2194 = shalt.err (!%p2191_p7)
}
  0x10   :  { %s2222_s7 = smov 128   ;;  %s2223_s8 = smov 8  }
  0x11   :  { %24 = dma.hbm_to_vmem [thread:$0]  %s2564_s0, 256, %s19_s22, [#allocation3], %s2222_s7, %s2222_s7, %s2223_s8  }
  0x12   :  { %2217 = dma.done.wait [#allocation3], 256  }
  0x13   :  { %2218 = vsyncadd [#allocation3], 4294967040  ;;  %vm49_vm0 = vcmask 261120   ;;  %v41_v0 = vld [vmem:[%s2565_s1] sm:$0xff]  ;;  %v42_v1 = vld [vmem:[%s2565_s1 + $0x8] sm:$0xff]  ;;  %v45_v8 = vlaneseq  ;;  %v2224_v14 = vmov 0.0  }
  0x14   :  { %v43_v2 = vld [vmem:[%s2565_s1 + $0x10] sm:$0xff]  ;;  %v2080_v3 = vpack.c.bf16 %v42_v1, %v41_v0  ;;  %v44_v4 = vld [vmem:[%s2565_s1 + $0x18] sm:$0xff]  ;;  %v2296_v5 = vld [vmem:[#allocation2] sm:$0xff]  ;;  %1969 = vmatprep.subr.mxu0 %v2224_v14  ;;  %s2225_s19 = smov 112   ;;  %s2226_s20 = smov 120   ;;  %vm2227_vm1 = vmmov 0  }
  0x15   :  { %v2084_v6 = vpack.c.bf16 %v44_v4, %v43_v2  ;;  %1956 = vmatprep.mubr.msk.f32.mxu1 %vm49_vm0, %v2296_v5  ;;  %v2300_v7 = vld [vmem:[#allocation2 + $0x8] sm:$0xff]  ;;  %v2304_v9 = vshrl.u32 %v45_v8, 7  ;;  %v2310_v11 = vld [vmem:[%s2569_s5] sm:$0xff]  ;;  %1971 = vmatprep.mubr.msk.f32.mxu0 %vm2227_vm1, %v2224_v14  ;;  %s2228_s5 = smov 104   ;;  %s2229_s21 = smov 96   ;;  %vm147_vm2 = vcmask 64512  }
  0x16   :  { %2081 = vmatprep.subr.bf16.mxu1 %v2080_v3  ;;  %s2230_s22 = smov 64   ;;  %s2231_s9 = smov 16   ;;  %vm1476_vm3 = vcmask 130048   ;;  %vm1479_vm4 = vcmask 195584   ;;  %vm1715_vm5 = vcmask 523264  }
  0x17   :  { %2083 = vmatpush3.bf16.msra.mxu1 %v2080_v3  ;;  %v47_v10 = vsub.s32 0, %v2304_v9  ;;  %s2232_s10 = smov 24  }
  0x18   :  { %2085 = vmatprep.subr.bf16.mxu1 %v2084_v6 }
  0x19   :  { %v48_v12 = vrot.slane %v2310_v11, %v47_v10 }
  0x1b   :  { %2087 = vmatpush3.bf16.msra.mxu1 %v2084_v6 }
  0x1c   :  { %1959 = vmatprep.subr.mxu1 %v2224_v14 }
  0x1e   :  { %1957 = vmatmul.mubr.msk.f32.vlgmr.msra.gmra.mrb[0].mxu1 %vm49_vm0, %v2300_v7 }
  0x1f   :  { %1961 = vmatprep.mubr.msk.f32.mxu1 %vm2227_vm1, %v2224_v14 }
  0xf1   :  { %v1958_v13 = vpop.f32.mrb[0].mxu1 }
  0xf2   :  { %v122_v15 = vpop.f32.mrb[1].mxu1  ;;  %v2323_v17 = vadd.f32 %v1958_v13, %v48_v12 }
  0xf3   :  { %v2315_v16 = vadd.f32 %v122_v15, %v48_v12 }
  0xf5   :  { %137 = vrot.lane.b32.xlu1 %v2315_v16, %s2225_s19  ;;  %133 = vrot.lane.b32.xlu0 %v2315_v16, %s2226_s20 }
  0xf9   :  { %139 = vrot.lane.b32.xlu1 %v2323_v17, %s2225_s19  ;;  %135 = vrot.lane.b32.xlu0 %v2323_v17, %s2226_s20 }
  0xfd   :  { %143 = vrot.lane.b32.xlu1 %v2323_v17, %s2228_s5  ;;  %141 = vrot.lane.b32.xlu0 %v2315_v16, %s2228_s5 }
 0x101   :  { %222 = vrot.lane.b32.xlu1 %v2323_v17, %s2229_s21  ;;  %145 = vrot.lane.b32.xlu0 %v2315_v16, %s2229_s21 }
 0x167   :  { %v2331_v18 = vpop.permute.xlu1 %137  ;;  %v2333_v19 = vpop.permute.xlu0 %133 }
 0x168   :  { %298 = vrot.lane.b32.xlu0 %v2333_v19, %s2229_s21 }
 0x16b   :  { %v2336_v20 = vpop.permute.xlu1 %139  ;;  %v2338_v21 = vpop.permute.xlu0 %135 }
 0x16c   :  { %450 = vrot.lane.b32.xlu0 %v2331_v18, %s2229_s21  ;;  %374 = vrot.lane.b32.xlu1 %v2338_v21, %s2229_s21 }
 0x16f   :  { %v2342_v22 = vpop.permute.xlu0 %141  ;;  %v2346_v23 = vpop.permute.xlu1 %143 }
 0x170   :  { %526 = vrot.lane.b32.xlu1 %v2336_v20, %s2229_s21  ;;  %602 = vrot.lane.b32.xlu0 %v2342_v22, %s2229_s21 }
 0x173   :  { %v146_v24 = vpop.permute.xlu0 %145  ;;  %v223_v25 = vpop.permute.xlu1 %222 }
 0x174   :  { %678 = vrot.lane.b32.xlu1 %v2346_v23, %s2229_s21  ;;  %1960 = vmatpush3.xpose.msk.msra.mxu1 %vm147_vm2, %v146_v24 }
 0x175   :  { %1964 = vmatprep.subr.mxu1 %v2224_v14 }
 0x177   :  { %1962 = vmatmul.mubr.msk.f32.vlgmr.msra.gmra.mrb[2].mxu1 %vm147_vm2, %v2315_v16 }
 0x178   :  { %1965 = vmatpush3.xpose.msk.msra.mxu1 %vm147_vm2, %v223_v25  ;;  %1966 = vmatprep.mubr.msk.f32.mxu1 %vm2227_vm1, %v2224_v14 }
 0x179   :  { %1974 = vmatprep.subr.mxu1 %v2224_v14 }
 0x17b   :  { %1967 = vmatmul.mubr.msk.f32.vlgmr.msra.gmra.mrb[4].mxu1 %vm147_vm2, %v2323_v17 }
 0x17c   :  { %1976 = vmatprep.mubr.msk.f32.mxu1 %vm2227_vm1, %v2224_v14 }
 0x1da   :  { %v299_v26 = vpop.permute.xlu0 %298 }
 0x1db   :  { %1970 = vmatpush3.xpose.msk.msra.mxu0 %vm147_vm2, %v299_v26 }
 0x1dc   :  { %1979 = vmatprep.subr.mxu0 %v2224_v14 }
 0x1de   :  { %v375_v27 = vpop.permute.xlu1 %374  ;;  %1972 = vmatmul.mubr.msk.f32.vlgmr.msra.gmra.mrb[0].mxu0 %vm147_vm2, %v2333_v19  ;;  %v451_v28 = vpop.permute.xlu0 %450 }
 0x1df   :  { %1975 = vmatpush3.xpose.msk.msra.mxu1 %vm147_vm2, %v375_v27  ;;  %1980 = vmatpush3.xpose.msk.msra.mxu0 %vm147_vm2, %v451_v28 }
 0x1e0   :  { %1981 = vmatprep.mubr.msk.f32.mxu0 %vm2227_vm1, %v2224_v14  ;;  %1984 = vmatprep.subr.mxu1 %v2224_v14 }
 0x1e1   :  { %1989 = vmatprep.subr.mxu0 %v2224_v14 }
 0x1e2   :  { %v527_v29 = vpop.permute.xlu1 %526  ;;  %1977 = vmatmul.mubr.msk.f32.vlgmr.msra.gmra.mrb[6].mxu1 %vm147_vm2, %v2338_v21  ;;  %1982 = vmatmul.mubr.msk.f32.vlgmr.msra.gmra.mrb[2].mxu0 %vm147_vm2, %v2331_v18  ;;  %v603_v30 = vpop.permute.xlu0 %602 }
 0x1e3   :  { %1985 = vmatpush3.xpose.msk.msra.mxu1 %vm147_vm2, %v527_v29  ;;  %1990 = vmatpush3.xpose.msk.msra.mxu0 %vm147_vm2, %v603_v30 }
 0x1e4   :  { %1986 = vmatprep.mubr.msk.f32.mxu1 %vm2227_vm1, %v2224_v14  ;;  %1991 = vmatprep.mubr.msk.f32.mxu0 %vm2227_vm1, %v2224_v14 }
 0x1e5   :  { %1994 = vmatprep.subr.mxu1 %v2224_v14  ;;  %1999 = vmatprep.subr.mxu0 %v2224_v14 }
 0x1e6   :  { %v679_v31 = vpop.permute.xlu1 %678  ;;  %1987 = vmatmul.mubr.msk.f32.vlgmr.msra.gmra.mrb[8].mxu1 %vm147_vm2, %v2336_v20  ;;  %1992 = vmatmul.mubr.msk.f32.vlgmr.msra.gmra.mrb[4].mxu0 %vm147_vm2, %v2342_v22 }
 0x1e7   :  { %1995 = vmatpush3.xpose.msk.msra.mxu1 %vm147_vm2, %v679_v31  ;;  %1996 = vmatprep.mubr.msk.f32.mxu1 %vm2227_vm1, %v2224_v14 }
 0x1e8   :  { %2004 = vmatprep.subr.mxu1 %v2224_v14  ;;  %2001 = vmatprep.mubr.msk.f32.mxu0 %vm2227_vm1, %v2224_v14 }
 0x1ea   :  { %1997 = vmatmul.mubr.msk.f32.vlgmr.msra.gmra.mrb[10].mxu1 %vm147_vm2, %v2346_v23 }
 0x1eb   :  { %2006 = vmatprep.mubr.msk.f32.mxu1 %vm2227_vm1, %v2224_v14 }
 0x24a   :  { %v218_v32 = vpop.f32.mrb[2].mxu1 }
 0x24b   :  { %v1963_v33 = vpop.f32.mrb[3].mxu1  ;;  %v754_v34 = vsel %vm147_vm2, %v218_v32, -inf }
 0x24c   :  { %755 = vmax.xlane.f32.xlu0 %v754_v34 }
 0x24e   :  { %v294_v35 = vpop.f32.mrb[4].mxu1 }
 0x24f   :  { %v1968_v36 = vpop.f32.mrb[5].mxu1  ;;  %v757_v37 = vsel %vm147_vm2, %v294_v35, -inf }
 0x250   :  { %758 = vmax.xlane.f32.xlu1 %v757_v37 }
 0x2b1   :  { %v370_v38 = vpop.f32.mrb[0].mxu0 }
 0x2b2   :  { %v1973_v39 = vpop.f32.mrb[1].mxu0  ;;  %v760_v40 = vsel %vm147_vm2, %v370_v38, -inf }
 0x2b3   :  { %761 = vmax.xlane.f32.xlu0 %v760_v40 }
 0x2b5   :  { %v446_v41 = vpop.f32.mrb[6].mxu1  ;;  %v522_v42 = vpop.f32.mrb[2].mxu0 }
 0x2b6   :  { %v1978_v43 = vpop.f32.mrb[7].mxu1  ;;  %v1983_v44 = vpop.f32.mrb[3].mxu0  ;;  %v763_v45 = vsel %vm147_vm2, %v446_v41, -inf  ;;  %v766_v46 = vsel %vm147_vm2, %v522_v42, -inf }
 0x2b7   :  { %764 = vmax.xlane.f32.xlu0 %v763_v45  ;;  %767 = vmax.xlane.f32.xlu1 %v766_v46 }
 0x2b9   :  { %v598_v47 = vpop.f32.mrb[8].mxu1  ;;  %v674_v48 = vpop.f32.mrb[4].mxu0 }
 0x2ba   :  { %v1988_v49 = vpop.f32.mrb[9].mxu1  ;;  %v1993_v50 = vpop.f32.mrb[5].mxu0  ;;  %v769_v51 = vsel %vm147_vm2, %v598_v47, -inf  ;;  %v772_v52 = vsel %vm147_vm2, %v674_v48, -inf }
 0x2bb   :  { %770 = vmax.xlane.f32.xlu0 %v769_v51  ;;  %773 = vmax.xlane.f32.xlu1 %v772_v52 }
 0x2bd   :  { %v750_v53 = vpop.f32.mrb[10].mxu1 }
 0x2be   :  { %v1998_v54 = vpop.f32.mrb[11].mxu1  ;;  %v775_v55 = vsel %vm147_vm2, %v750_v53, -inf }
 0x2bf   :  { %776 = vmax.xlane.f32.xlu0 %v775_v55 }
 0x2cc   :  { %842 = vrot.lane.b32.xlu1 %v2315_v16, %s2230_s22 }
 0x2d0   :  { %994 = vrot.lane.b32.xlu1 %v2333_v19, %s2230_s22 }
 0x2d4   :  { %1070 = vrot.lane.b32.xlu1 %v2338_v21, %s2230_s22 }
 0x2d5   :  { %918 = vrot.lane.b32.xlu0 %v2323_v17, %s2230_s22 }
 0x2d8   :  { %1222 = vrot.lane.b32.xlu1 %v2336_v20, %s2230_s22 }
 0x2d9   :  { %1146 = vrot.lane.b32.xlu0 %v2331_v18, %s2230_s22  ;;  %v756_v58 = vpop.xlane.xlu0 %755 }
 0x2da   :  { %v778_v59 = vsub.f32 %v218_v32, %v756_v58 }
 0x2dc   :  { %v786_v61 = vmul.f32 1.442695, %v778_v59 }
 0x2dd   :  { %v759_v56 = vpop.xlane.xlu1 %758 }
 0x2de   :  { %v779_v57 = vsub.f32 %v294_v35, %v759_v56 }
 0x2e0   :  { %v788_v60 = vmul.f32 1.442695, %v779_v57 }
 0x2e2   :  { %2133 = vpow2.f32 %v788_v60 }
 0x2e3   :  { %2135 = vpow2.f32 %v786_v61 }
 0x2ec   :  { %v2417_v62 = vpop.eup %2133 }
 0x2ed   :  { %v805_v63 = vsel %vm147_vm2, %v2417_v62, 0.0  ;;  %v2421_v0 = vpop.eup %2135 }
 0x2ee   :  { %v802_v1 = vsel %vm147_vm2, %v2421_v0, 0.0 }
 0x2f8   :  { %806 = vadd.xlane.f32.xlu0 %v805_v63 }
 0x2fc   :  { %803 = vadd.xlane.f32.xlu1 %v802_v1 }
 0x340   :  { %v762_v2 = vpop.xlane.xlu0 %761 }
 0x341   :  { %v780_v3 = vsub.f32 %v370_v38, %v762_v2 }
 0x343   :  { %v790_v4 = vmul.f32 1.442695, %v780_v3 }
 0x344   :  { %v768_v6 = vpop.xlane.xlu1 %767  ;;  %v765_v8 = vpop.xlane.xlu0 %764 }
 0x345   :  { %2137 = vpow2.f32 %v790_v4  ;;  %v782_v10 = vsub.f32 %v522_v42, %v768_v6  ;;  %v781_v12 = vsub.f32 %v446_v41, %v765_v8 }
 0x347   :  { %v794_v13 = vmul.f32 1.442695, %v782_v10  ;;  %v792_v15 = vmul.f32 1.442695, %v781_v12 }
 0x348   :  { %v774_v16 = vpop.xlane.xlu1 %773  ;;  %v771_v17 = vpop.xlane.xlu0 %770 }
 0x349   :  { %2139 = vpow2.f32 %v794_v13  ;;  %v784_v18 = vsub.f32 %v674_v48, %v774_v16  ;;  %v783_v19 = vsub.f32 %v598_v47, %v771_v17  ;;  %v1482_v13 = vld [vmem:[%s2566_s2] sm:$0xff]  ;;  %v1485_v17 = vld [vmem:[%s2566_s2 + $0x18] sm:$0xff] }
 0x34a   :  { %2141 = vpow2.f32 %v792_v15  ;;  %v1483_v15 = vld [vmem:[%s2566_s2 + $0x8] sm:$0xff] }
 0x34b   :  { %v798_v20 = vmul.f32 1.442695, %v784_v18  ;;  %v796_v21 = vmul.f32 1.442695, %v783_v19  ;;  %v2088_v16 = vpack.c.bf16 %v1483_v15, %v1482_v13  ;;  %v1707_v13 = vld [vmem:[%s2568_s4 + $0x20] sm:$0xff]  ;;  %v1708_v15 = vld [vmem:[%s2568_s4 + $0x28] sm:$0xff] }
 0x34c   :  { %v843_v24 = vpop.permute.xlu1 %842  ;;  %v777_v25 = vpop.xlane.xlu0 %776 }
 0x34d   :  { %2143 = vpow2.f32 %v798_v20  ;;  %v785_v26 = vsub.f32 %v750_v53, %v777_v25  ;;  %2000 = vmatpush3.msra.mxu0 %v843_v24 }
 0x34e   :  { %2145 = vpow2.f32 %v796_v21  ;;  %2009 = vmatprep.subr.mxu0 %v2224_v14 }
 0x34f   :  { %v2138_v27 = vpop.eup %2137  ;;  %v800_v28 = vmul.f32 1.442695, %v785_v26 }
 0x350   :  { %v919_v29 = vpop.permute.xlu0 %918  ;;  %v808_v30 = vsel %vm147_vm2, %v2138_v27, 0.0  ;;  %v995_v41 = vpop.permute.xlu1 %994 }
 0x351   :  { %2147 = vpow2.f32 %v800_v28  ;;  %809 = vadd.xlane.f32.xlu1 %v808_v30  ;;  %2005 = vmatpush3.msra.mxu1 %v919_v29 }
 0x352   :  { %2014 = vmatprep.subr.mxu1 %v2224_v14 }
 0x353   :  { %v2140_v31 = vpop.eup %2139 }
 0x354   :  { %v2142_v32 = vpop.eup %2141  ;;  %v814_v33 = vsel %vm147_vm2, %v2140_v31, 0.0  ;;  %v1071_v42 = vpop.permute.xlu1 %1070 }
 0x355   :  { %815 = vadd.xlane.f32.xlu1 %v814_v33  ;;  %v811_v34 = vsel %vm147_vm2, %v2142_v32, 0.0  ;;  %v1147_v43 = vpop.permute.xlu0 %1146 }
 0x356   :  { %812 = vadd.xlane.f32.xlu0 %v811_v34 }
 0x357   :  { %v2144_v35 = vpop.eup %2143 }
 0x358   :  { %v2146_v36 = vpop.eup %2145  ;;  %v820_v37 = vsel %vm147_vm2, %v2144_v35, 0.0  ;;  %v1223_v44 = vpop.permute.xlu1 %1222 }
 0x359   :  { %821 = vadd.xlane.f32.xlu1 %v820_v37  ;;  %v817_v38 = vsel %vm147_vm2, %v2146_v36, 0.0 }
 0x35a   :  { %818 = vadd.xlane.f32.xlu0 %v817_v38 }
 0x35b   :  { %v2432_v39 = vpop.eup %2147 }
 0x35c   :  { %v823_v40 = vsel %vm147_vm2, %v2432_v39, 0.0 }
 0x35e   :  { %824 = vadd.xlane.f32.xlu0 %v823_v40 }
 0x36a   :  { %1374 = vrot.lane.b32.xlu1 %v2346_v23, %s2230_s22 }
 0x374   :  { %1298 = vrot.lane.b32.xlu0 %v2342_v22, %s2230_s22 }
 0x385   :  { %v807_v45 = vpop.xlane.xlu0 %806 }
 0x386   :  { %2149 = vrcp.f32 %v807_v45  ;;  %v1488_v45 = vsub.s32 2, %v2304_v9 }
 0x389   :  { %v804_v46 = vpop.xlane.xlu1 %803 }
 0x38a   :  { %2151 = vrcp.f32 %v804_v46  ;;  %v1489_v46 = vrot.slane %v2310_v11, %v1488_v45 }
 0x390   :  { %v2150_v47 = vpop.eup %2149 }
 0x391   :  { %v835_v48 = vmul.f32 %v2150_v47, %v2417_v62 }
 0x393   :  { %2007 = vmatmul.mubr.msk.f32.vlgmr.msra.gmra.mrb[12].mxu1 %vm147_vm2, %v835_v48 }
 0x394   :  { %v2152_v49 = vpop.eup %2151  ;;  %2015 = vmatpush3.msra.mxu1 %v1071_v42  ;;  %2016 = vmatprep.mubr.msk.f32.mxu1 %vm2227_vm1, %v2224_v14 }
 0x395   :  { %v834_v22 = vmul.f32 %v2152_v49, %v2421_v0  ;;  %2024 = vmatprep.subr.mxu1 %v2224_v14 }
 0x397   :  { %2002 = vmatmul.mubr.msk.f32.vlgmr.msra.gmra.mrb[6].mxu0 %vm147_vm2, %v834_v22 }
 0x398   :  { %2010 = vmatpush3.msra.mxu0 %v995_v41  ;;  %2011 = vmatprep.mubr.msk.f32.mxu0 %vm2227_vm1, %v2224_v14 }
 0x399   :  { %2019 = vmatprep.subr.mxu0 %v2224_v14 }
 0x3de   :  { %v810_v23 = vpop.xlane.xlu1 %809 }
 0x3df   :  { %2153 = vrcp.f32 %v810_v23 }
 0x3e2   :  { %v816_v50 = vpop.xlane.xlu1 %815 }
 0x3e3   :  { %2155 = vrcp.f32 %v816_v50  ;;  %v813_v51 = vpop.xlane.xlu0 %812 }
 0x3e4   :  { %2157 = vrcp.f32 %v813_v51 }
 0x3e6   :  { %v822_v52 = vpop.xlane.xlu1 %821 }
 0x3e7   :  { %2159 = vrcp.f32 %v822_v52  ;;  %v819_v53 = vpop.xlane.xlu0 %818 }
 0x3e8   :  { %2161 = vrcp.f32 %v819_v53 }
 0x3e9   :  { %v2154_v54 = vpop.eup %2153 }
 0x3ea   :  { %v836_v55 = vmul.f32 %v2154_v54, %v2138_v27  ;;  %v1375_v2 = vpop.permute.xlu1 %1374 }
 0x3eb   :  { %v825_v56 = vpop.xlane.xlu0 %824 }
 0x3ec   :  { %2163 = vrcp.f32 %v825_v56  ;;  %2012 = vmatmul.mubr.msk.f32.vlgmr.msra.gmra.mrb[8].mxu0 %vm147_vm2, %v836_v55 }
 0x3ed   :  { %v2156_v57 = vpop.eup %2155  ;;  %2020 = vmatpush3.msra.mxu0 %v1147_v43  ;;  %2021 = vmatprep.mubr.msk.f32.mxu0 %vm2227_vm1, %v2224_v14 }
 0x3ee   :  { %v2158_v58 = vpop.eup %2157  ;;  %v838_v59 = vmul.f32 %v2156_v57, %v2140_v31  ;;  %2029 = vmatprep.subr.mxu0 %v2224_v14 }
 0x3ef   :  { %v837_v60 = vmul.f32 %v2158_v58, %v2142_v32  ;;  %v1299_v61 = vpop.permute.xlu0 %1298 }
 0x3f0   :  { %2022 = vmatmul.mubr.msk.f32.vlgmr.msra.gmra.mrb[10].mxu0 %vm147_vm2, %v838_v59 }
 0x3f1   :  { %v2160_v62 = vpop.eup %2159  ;;  %2017 = vmatmul.mubr.msk.f32.vlgmr.msra.gmra.mrb[14].mxu1 %vm147_vm2, %v837_v60  ;;  %2030 = vmatpush3.msra.mxu0 %v1299_v61 }
 0x3f2   :  { %v2162_v63 = vpop.eup %2161  ;;  %v840_v0 = vmul.f32 %v2160_v62, %v2144_v35  ;;  %2025 = vmatpush3.msra.mxu1 %v1223_v44  ;;  %2026 = vmatprep.mubr.msk.f32.mxu1 %vm2227_vm1, %v2224_v14  ;;  %v1613_v62 = vld [vmem:[%s2567_s3 + $0x8] sm:$0xff] }
 0x3f3   :  { %v839_v1 = vmul.f32 %v2162_v63, %v2146_v36  ;;  %2031 = vmatprep.mubr.msk.f32.mxu0 %vm2227_vm1, %v2224_v14  ;;  %2034 = vmatprep.subr.mxu1 %v2224_v14 }
 0x3f4   :  { %2032 = vmatmul.mubr.msk.f32.vlgmr.msra.gmra.mrb[12].mxu0 %vm147_vm2, %v840_v0  ;;  %2089 = vmatprep.subr.bf16.mxu0 %v2088_v16  ;;  %v1614_v0 = vld [vmem:[%s2567_s3 + $0x10] sm:$0xff] }
 0x3f5   :  { %2027 = vmatmul.mubr.msk.f32.vlgmr.msra.gmra.mrb[16].mxu1 %vm147_vm2, %v839_v1  ;;  %2091 = vmatpush3.bf16.msra.mxu0 %v2088_v16  ;;  %v1615_v1 = vld [vmem:[%s2567_s3 + $0x18] sm:$0xff]  ;;  %v2112_v16 = vpack.c.bf16 %v1708_v15, %v1707_v13 }
 0x3f6   :  { %v2164_v3 = vpop.eup %2163  ;;  %2035 = vmatpush3.msra.mxu1 %v1375_v2  ;;  %2036 = vmatprep.mubr.msk.f32.mxu1 %vm2227_vm1, %v2224_v14  ;;  %v1484_v14 = vld [vmem:[%s2566_s2 + $0x10] sm:$0xff]  ;;  %v2100_v2 = vpack.c.bf16 %v1615_v1, %v1614_v0 }
 0x3f7   :  { %v841_v4 = vmul.f32 %v2164_v3, %v2432_v39  ;;  %v2092_v18 = vpack.c.bf16 %v1485_v17, %v1484_v14  ;;  %v1703_v3 = vld [vmem:[%s2568_s4] sm:$0xff] }
 0x3f9   :  { %2037 = vmatmul.mubr.msk.f32.vlgmr.msra.gmra.mrb[18].mxu1 %vm147_vm2, %v841_v4  ;;  %2093 = vmatprep.subr.bf16.mxu0 %v2092_v18  ;;  %v1704_v4 = vld [vmem:[%s2568_s4 + $0x8] sm:$0xff] }
 0x3fa   :  { %2095 = vmatpush3.bf16.msra.mxu0 %v2092_v18 }
 0x466   :  { %v990_v6 = vpop.f32.mrb[12].mxu1 }
 0x467   :  { %v2008_v8 = vpop.f32.mrb[13].mxu1 }
 0x468   :  { %v2104_v8 = vpack.c.bf16 %v1704_v4, %v1703_v3 }
 0x46a   :  { %v914_v10 = vpop.f32.mrb[6].mxu0  ;;  %2105 = vmatprep.subr.bf16.mxu0 %v2104_v8 }
 0x46b   :  { %v2003_v12 = vpop.f32.mrb[7].mxu0 }
 0x4bf   :  { %v1066_v19 = vpop.f32.mrb[8].mxu0 }
 0x4c0   :  { %v2013_v20 = vpop.f32.mrb[9].mxu0  ;;  %1452 = vrot.lane.b32.xlu0 %v1066_v19, %s2223_s8 }
 0x4c3   :  { %v1218_v21 = vpop.f32.mrb[10].mxu0 }
 0x4c4   :  { %v1142_v24 = vpop.f32.mrb[14].mxu1  ;;  %1460 = vrot.lane.b32.xlu0 %v1218_v21, %s2231_s9  ;;  %v2023_v25 = vpop.f32.mrb[11].mxu0 }
 0x4c5   :  { %1454 = vrot.lane.b32.xlu1 %v1142_v24, %s2223_s8  ;;  %v2018_v26 = vpop.f32.mrb[15].mxu1  ;;  %v1602_v24 = vsub.s32 4, %v2304_v9  ;;  %v1608_v25 = vsub.s32 5, %v2304_v9 }
 0x4c7   :  { %v1370_v27 = vpop.f32.mrb[12].mxu0  ;;  %v1603_v26 = vrot.slane %v2310_v11, %v1602_v24 }
 0x4c8   :  { %v1294_v28 = vpop.f32.mrb[16].mxu1  ;;  %1468 = vrot.lane.b32.xlu0 %v1370_v27, %s2232_s10  ;;  %v2033_v29 = vpop.f32.mrb[13].mxu0 }
 0x4c9   :  { %1462 = vrot.lane.b32.xlu1 %v1294_v28, %s2231_s9  ;;  %v2028_v30 = vpop.f32.mrb[17].mxu1  ;;  %v1609_v29 = vrot.slane %v2310_v11, %v1608_v25 }
 0x4cc   :  { %v1446_v31 = vpop.f32.mrb[18].mxu1 }
 0x4cd   :  { %1470 = vrot.lane.b32.xlu1 %v1446_v31, %s2232_s10  ;;  %v2038_v32 = vpop.f32.mrb[19].mxu1 }
 0x532   :  { %v1453_v33 = vpop.permute.xlu0 %1452 }
 0x533   :  { %v1474_v36 = vsel %vm147_vm2, %v914_v10, %v1453_v33  ;;  %v1706_v10 = vld [vmem:[%s2568_s4 + $0x18] sm:$0xff] }
 0x536   :  { %v1461_v34 = vpop.permute.xlu0 %1460 }
 0x537   :  { %v1455_v35 = vpop.permute.xlu1 %1454  ;;  %v1477_v37 = vsel %vm1476_vm3, %v1474_v36, %v1461_v34  ;;  %v1709_v36 = vld [vmem:[%s2568_s4 + $0x30] sm:$0xff] }
 0x538   :  { %v1475_v41 = vsel %vm147_vm2, %v990_v6, %v1455_v35  ;;  %v1705_v6 = vld [vmem:[%s2568_s4 + $0x10] sm:$0xff] }
 0x539   :  { %v2108_v12 = vpack.c.bf16 %v1706_v10, %v1705_v6  ;;  %v1827_v6 = vsub.s32 6, %v2304_v9 }
 0x53a   :  { %v1469_v38 = vpop.permute.xlu0 %1468 }
 0x53b   :  { %v1463_v39 = vpop.permute.xlu1 %1462  ;;  %v1480_v40 = vsel %vm1479_vm4, %v1477_v37, %v1469_v38  ;;  %v1710_v37 = vld [vmem:[%s2568_s4 + $0x38] sm:$0xff]  ;;  %v1828_v10 = vrot.slane %v2310_v11, %v1827_v6  ;;  %s2233_s4 = smov [#allocation5]  }
 0x53c   :  { %2047 = vmatprep.mubr.msk.f32.mxu0 %vm49_vm0, %v1480_v40  ;;  %v1478_v42 = vsel %vm1476_vm3, %v1475_v41, %v1463_v39  ;;  %v2116_v38 = vpack.c.bf16 %v1710_v37, %v1709_v36  ;;  %v1618_v39 = vsub.s32 1, %v2304_v9  ;;  %s1844_s30 = sshll.u32 %s2233_s4, 4  ;;  %s1845_s30 = int_to_ptr.vmem [resolvable:$true] %s1844_s30 }
 0x53d   :  { %s2195_s9 = scalar_lea.vmem %s1845_s30, 256  ;;  %p2200_p9 = scmp.lt.s32.totalorder %s1845_s30, %s1845_s30 }
 0x53e   :  { %v1619_v40 = vrot.slane %v2310_v11, %v1618_v39  ;;  %p2196_p8 = scmp.ne.s32.totalorder %s1845_s30, %s2195_s9  ;;  %p2201_p10 = scmp.lt.s32.totalorder %s2195_s9, %s2195_s9 }
 0x53f   :  { %v1471_v43 = vpop.permute.xlu1 %1470 }
 0x540   :  { %v1481_v44 = vsel %vm1479_vm4, %v1478_v42, %v1471_v43  ;;  %p2202_p11 = por %p2201_p10, %p2200_p9 }
 0x541   :  { %2048 = vmatmul.mubr.msk.f32.vlgmr.msra.gmra.mrb[14].mxu0 %vm49_vm0, %v1481_v44 }
 0x542   :  { %2107 = vmatpush3.bf16.msra.mxu0 %v2104_v8  ;;  %v1833_v8 = vsub.s32 7, %v2304_v9  ;;  %p2203_p12 = pnand %p2202_p11, %p2196_p8 }
 0x543   :  { %2109 = vmatprep.subr.bf16.mxu0 %v2108_v12 }
 0x546   :  { %2111 = vmatpush3.bf16.msra.mxu0 %v2108_v12 }
 0x547   :  { %2113 = vmatprep.subr.bf16.mxu0 %v2112_v16 }
 0x54a   :  { %2115 = vmatpush3.bf16.msra.mxu0 %v2112_v16  ;;  %v1834_v16 = vrot.slane %v2310_v11, %v1833_v8 }
 0x54b   :  { %2117 = vmatprep.subr.bf16.mxu0 %v2116_v38 }
 0x54e   :  { %2119 = vmatpush3.bf16.msra.mxu0 %v2116_v38 }
 0x614   :  { %v2049_v47 = vpop.f32.mrb[14].mxu0 }
 0x615   :  { %v1568_v48 = vadd.f32 %v2049_v47, %v1489_v46  ;;  %v1562_v49 = vpop.f32.mrb[15].mxu0  ;;  %v1713_v47 = vsub.s32 3, %v2304_v9 }
 0x616   :  { %v1563_v22 = vadd.f32 %v1562_v49, %v1489_v46 }
 0x617   :  { %v1572_v23 = vadd.f32 %v1568_v48, %v2300_v7  ;;  %v1714_v48 = vrot.slane %v2310_v11, %v1713_v47 }
 0x618   :  { %v1571_v50 = vadd.f32 %v1563_v22, %v2296_v5  ;;  %v1612_v5 = vld [vmem:[%s2567_s3] sm:$0xff] }
 0x619   :  { %v1576_v51 = vsel %vm49_vm0, %v1572_v23, 0.0  ;;  %v2096_v63 = vpack.c.bf16 %v1613_v62, %v1612_v5 }
 0x61a   :  { %1577 = vadd.xlane.f32.xlu1 %v1576_v51  ;;  %v1573_v52 = vsel %vm49_vm0, %v1571_v50, 0.0 }
 0x61b   :  { %1574 = vadd.xlane.f32.xlu0 %v1573_v52  ;;  %2097 = vmatprep.subr.bf16.mxu1 %v2096_v63 }
 0x61c   :  { %2099 = vmatpush3.bf16.msra.mxu1 %v2096_v63 }
 0x61d   :  { %2101 = vmatprep.subr.bf16.mxu1 %v2100_v2 }
 0x620   :  { %2103 = vmatpush3.bf16.msra.mxu1 %v2100_v2 }
 0x6a7   :  { %v1578_v53 = vpop.xlane.xlu1 %1577 }
 0x6a8   :  { %v1581_v54 = vmul.f32 0.03125, %v1578_v53  ;;  %v1575_v55 = vpop.xlane.xlu0 %1574 }
 0x6a9   :  { %v1580_v56 = vmul.f32 0.03125, %v1575_v55 }
 0x6aa   :  { %v1583_v57 = vsub.f32 %v1572_v23, %v1581_v54 }
 0x6ab   :  { %v1582_v58 = vsub.f32 %v1571_v50, %v1580_v56 }
 0x6ac   :  { %v1585_v61 = vmul.f32 %v1583_v57, %v1583_v57 }
 0x6ad   :  { %v1584_v59 = vmul.f32 %v1582_v58, %v1582_v58 }
 0x6ae   :  { %v1589_v7 = vsel %vm49_vm0, %v1585_v61, 0.0 }
 0x6af   :  { %v1586_v60 = vsel %vm49_vm0, %v1584_v59, 0.0 }
 0x6b0   :  { %1587 = vadd.xlane.f32.xlu0 %v1586_v60 }
 0x6b4   :  { %1590 = vadd.xlane.f32.xlu0 %v1589_v7 }
 0x73d   :  { %v1588_v14 = vpop.xlane.xlu0 %1587 }
 0x73e   :  { %v1592_v17 = vmul.f32 0.03125, %v1588_v14 }
 0x740   :  { %v1594_v18 = vadd.f32 1e-05, %v1592_v17 }
 0x741   :  { %v1591_v19 = vpop.xlane.xlu0 %1590 }
 0x742   :  { %2165 = vrsqrt.f32 %v1594_v18  ;;  %v1593_v20 = vmul.f32 0.03125, %v1591_v19 }
 0x744   :  { %v1595_v21 = vadd.f32 1e-05, %v1593_v20 }
 0x746   :  { %2167 = vrsqrt.f32 %v1595_v21 }
 0x74c   :  { %v2166_v27 = vpop.eup %2165 }
 0x74d   :  { %v1598_v28 = vmul.f32 %v2166_v27, %v1582_v58 }
 0x74f   :  { %v1604_v30 = vmul.f32 %v1603_v26, %v1598_v28 }
 0x750   :  { %v2168_v31 = vpop.eup %2167 }
 0x751   :  { %v1599_v32 = vmul.f32 %v2168_v31, %v1583_v57  ;;  %v1610_v33 = vadd.f32 %v1609_v29, %v1604_v30 }
 0x753   :  { %v1605_v34 = vmul.f32 %v1603_v26, %v1599_v32  ;;  %2058 = vmatprep.mubr.msk.f32.mxu1 %vm49_vm0, %v1610_v33 }
 0x755   :  { %v1611_v35 = vadd.f32 %v1609_v29, %v1605_v34 }
 0x757   :  { %2059 = vmatmul.mubr.msk.f32.vlgmr.msra.gmra.mrb[20].mxu1 %vm49_vm0, %v1611_v35 }
 0x82a   :  { %v2060_v41 = vpop.f32.mrb[20].mxu1 }
 0x82b   :  { %v1698_v42 = vadd.f32 %v2060_v41, %v1619_v40  ;;  %v1692_v43 = vpop.f32.mrb[21].mxu1 }
 0x82c   :  { %v1693_v44 = vadd.f32 %v1692_v43, %v1619_v40 }
 0x82d   :  { %v1702_v46 = vmax.f32 %v1698_v42, 0.0 }
 0x82e   :  { %v1701_v45 = vmax.f32 %v1693_v44, 0.0 }
 0x830   :  { %2077 = vmatprep.mubr.msk.f32.mxu0 %vm1715_vm5, %v1701_v45 }
 0x831   :  { %2078 = vmatmul.mubr.msk.f32.vlgmr.msra.gmra.mrb[16].mxu0 %vm1715_vm5, %v1702_v46 }
 0x904   :  { %v2079_v49 = vpop.f32.mrb[16].mxu0 }
 0x905   :  { %v1794_v22 = vadd.f32 %v2079_v49, %v1714_v48  ;;  %v1788_v23 = vpop.f32.mrb[17].mxu0 }
 0x906   :  { %v1789_v50 = vadd.f32 %v1788_v23, %v1714_v48 }
 0x907   :  { %v1798_v51 = vadd.f32 %v1794_v22, %v1611_v35 }
 0x908   :  { %v1797_v52 = vadd.f32 %v1789_v50, %v1610_v33 }
 0x909   :  { %v1802_v53 = vsel %vm49_vm0, %v1798_v51, 0.0 }
 0x90a   :  { %1803 = vadd.xlane.f32.xlu0 %v1802_v53  ;;  %v1799_v54 = vsel %vm49_vm0, %v1797_v52, 0.0 }
 0x90b   :  { %1800 = vadd.xlane.f32.xlu1 %v1799_v54 }
 0x997   :  { %v1804_v55 = vpop.xlane.xlu0 %1803 }
 0x998   :  { %v1806_v56 = vmul.f32 0.03125, %v1804_v55  ;;  %v1801_v57 = vpop.xlane.xlu1 %1800 }
 0x999   :  { %v1805_v58 = vmul.f32 0.03125, %v1801_v57 }
 0x99a   :  { %v1808_v59 = vsub.f32 %v1798_v51, %v1806_v56 }
 0x99b   :  { %v1807_v60 = vsub.f32 %v1797_v52, %v1805_v58 }
 0x99c   :  { %v1810_v61 = vmul.f32 %v1808_v59, %v1808_v59 }
 0x99d   :  { %v1809_v7 = vmul.f32 %v1807_v60, %v1807_v60 }
 0x99e   :  { %v1814_v5 = vsel %vm49_vm0, %v1810_v61, 0.0 }
 0x99f   :  { %1815 = vadd.xlane.f32.xlu0 %v1814_v5  ;;  %v1811_v62 = vsel %vm49_vm0, %v1809_v7, 0.0 }
 0x9a0   :  { %1812 = vadd.xlane.f32.xlu1 %v1811_v62 }
 0xa2c   :  { %v1816_v63 = vpop.xlane.xlu0 %1815 }
 0xa2d   :  { %v1818_v0 = vmul.f32 0.03125, %v1816_v63  ;;  %v1813_v1 = vpop.xlane.xlu1 %1812 }
 0xa2e   :  { %v1817_v2 = vmul.f32 0.03125, %v1813_v1 }
 0xa2f   :  { %v1820_v3 = vadd.f32 1e-05, %v1818_v0 }
 0xa30   :  { %v1819_v4 = vadd.f32 1e-05, %v1817_v2 }
 0xa31   :  { %2169 = vrsqrt.f32 %v1820_v3 }
 0xa32   :  { %2171 = vrsqrt.f32 %v1819_v4 }
 0xa3b   :  { %v2170_v12 = vpop.eup %2169 }
 0xa3c   :  { %v2172_v13 = vpop.eup %2171  ;;  %v1824_v15 = vmul.f32 %v2170_v12, %v1808_v59 }
 0xa3d   :  { %v1823_v14 = vmul.f32 %v2172_v13, %v1807_v60 }
 0xa3e   :  { %v1830_v17 = vmul.f32 %v1828_v10, %v1824_v15 }
 0xa3f   :  { %v1829_v18 = vmul.f32 %v1828_v10, %v1823_v14 }
 0xa40   :  { %v1836_v19 = vadd.f32 %v1834_v16, %v1830_v17 }
 0xa41   :  { %v1835_v20 = vadd.f32 %v1834_v16, %v1829_v18 }
 0xa42   :  { %1838 = vst.msk [vmem:[#allocation5 + $0x8] sm:$0xff] %vm49_vm0, %v1836_v19 }
 0xa43   :  { %1837 = vst.msk [vmem:[#allocation5] sm:$0xff] %vm49_vm0, %v1835_v20 }
 0xa44   :  { %2206 = shalt.err (!%p2203_p12)
}
 0xa45   :  { %s2207_s11 = scalar_lea.hbm %s2570_s6, 256 }
 0xa46   :  { %p2208_p13 = scmp.ne.s32.totalorder %s2570_s6, %s2207_s11  ;;  %p2211_p0 = scmp.lt.u32.totalorder %s2207_s11, %s2570_s6 }
 0xa48   :  { %p2213_p1 = pnand %p2211_p0, %p2208_p13 }
 0xa4a   :  { %2216 = shalt.err (!%p2213_p1)
}
 0xa4b   :  { %1850 = dma.vmem_to_hbm [thread:$0]  %s1845_s30, 256, %s2570_s6, [#allocation4], %s2222_s7, %s2222_s7, %s2223_s8  }
 0xa4c   :  { %2219 = dma.done.wait [#allocation4], 256  }
 0xa4d   :  { %2220 = vsyncadd [#allocation4], 4294967040 }
 0xa4e   :  { %1854 = vsyncpa [#allocation3], 1 }
 0xa4f   :  { %1855 = vsyncpa [#allocation4], 1 }

</bundles_post_ra>
